<compile_context>
chip_gen: v7x
topology: tpu7x:2x2x1
jax: 0.10.0
libtpu: 0.0.40
codegen_flags: <defaults>
</compile_context>

<pallas_src>
import math
import functools

import jax
import jax.numpy as jnp
from jax import lax
from jax.experimental import pallas as pl
from jax.experimental.pallas import tpu as pltpu


# ----------------------------------------------------------------------------
# Small-vocab fast path: VMEM-resident table + exact one-hot MXU gather
# ----------------------------------------------------------------------------
def _exact_rowselect(onehot, tab_f32, *, split):
    """onehot @ tab, exact even if the MXU runs bf16 passes.

    When `split` is True the f32 table is decomposed into three bf16-exact
    f32 parts (hi/mid/lo); each partial matmul is then exact (values are
    losslessly representable in bf16, products are x*1 or x*0, accumulation
    is f32), and the final f32 additions reconstruct the original values.
    """
    if not split:
        return jnp.dot(onehot, tab_f32, preferred_element_type=jnp.float32)
    hi = tab_f32.astype(jnp.bfloat16).astype(jnp.float32)
    rem = tab_f32 - hi
    mid = rem.astype(jnp.bfloat16).astype(jnp.float32)
    lo = rem - mid
    out = jnp.dot(onehot, hi, preferred_element_type=jnp.float32)
    out = out + jnp.dot(onehot, mid, preferred_element_type=jnp.float32)
    out = out + jnp.dot(onehot, lo, preferred_element_type=jnp.float32)
    return out


def _onehot_gather(ids_ref, table_ref, *, vocab, scale, split):
    ids = jnp.clip(ids_ref[...], 0, vocab - 1)                    # (tb, 1) int32
    iota = lax.broadcasted_iota(jnp.int32, (ids.shape[0], vocab), 1)
    onehot = (ids == iota).astype(jnp.float32)                    # (tb, V)
    tok = _exact_rowselect(onehot, table_ref[...].astype(jnp.float32), split=split)
    if scale != 1.0:
        tok = tok * scale
    return tok


def embed_vmem_pos_kernel(ids_ref, table_ref, pos_ref, out_ref, *,
                          vocab, scale, split):
    tok = _onehot_gather(ids_ref, table_ref, vocab=vocab, scale=scale, split=split)
    out_ref[...] = (tok + pos_ref[...].astype(jnp.float32)).astype(out_ref.dtype)


def embed_vmem_kernel(ids_ref, table_ref, out_ref, *, vocab, scale, split):
    tok = _onehot_gather(ids_ref, table_ref, vocab=vocab, scale=scale, split=split)
    out_ref[...] = tok.astype(out_ref.dtype)


# ----------------------------------------------------------------------------
# Large-vocab path: HBM-resident table + double-buffered per-row DMA gather
# ----------------------------------------------------------------------------
def _issue_row_gather(ids_ref, emb_hbm, gbuf, sem, *, batch_idx, slot, base,
                      seq_len, vocab, tb, unroll):
    """Start tb row DMAs table[ids[batch_idx, base+t]] -> gbuf[slot, t]."""
    def _start(t, carry):
        tok = ids_ref[batch_idx * seq_len + base + t]
        tok = jnp.minimum(jnp.maximum(tok, 0), vocab - 1)   # clamp (matches jnp gather)
        pltpu.make_async_copy(
            emb_hbm.at[pl.ds(tok, 1), :],
            gbuf.at[slot, pl.ds(t, 1), :],
            sem.at[slot],
        ).start()
        return carry
    lax.fori_loop(0, tb, _start, 0, unroll=unroll)


def _hbm_gather_tile(ids_ref, emb_hbm, gbuf, sem, *, tb, seq_len, vocab, unroll):
    """Cross-step double-buffered gather.

    Slot b%2 holds this step's rows.  Before waiting on it we launch the DMAs
    for the NEXT batch step (same seq tile) into the other slot, so the gather
    for step i+1 overlaps the compute/store of step i.  Requires the batch
    grid axis to be 'arbitrary' (sequential per core).
    """
    j = pl.program_id(0)
    b = pl.program_id(1)
    nb = pl.num_programs(1)
    base = j * tb

    @pl.when(b == 0)                       # prime the pipeline on the first batch step
    def _():
        _issue_row_gather(ids_ref, emb_hbm, gbuf, sem, batch_idx=b, slot=0,
                          base=base, seq_len=seq_len, vocab=vocab, tb=tb,
                          unroll=unroll)

    @pl.when(b + 1 < nb)                   # prefetch next batch step into other slot
    def _():
        _issue_row_gather(ids_ref, emb_hbm, gbuf, sem, batch_idx=b + 1,
                          slot=(b + 1) % 2, base=base, seq_len=seq_len,
                          vocab=vocab, tb=tb, unroll=unroll)

    slot = b % 2
    # Aggregate wait: DMA semaphores are size-counted, so one descriptor that
    # covers all tb rows of this slot drains the tb per-row completions with a
    # single wait (descriptor src slice is only used for size accounting).
    pltpu.make_async_copy(
        emb_hbm.at[pl.ds(0, tb), :], gbuf.at[slot], sem.at[slot]
    ).wait()
    return gbuf[slot].astype(jnp.float32)


def embed_hbm_pos_kernel(ids_ref, emb_hbm, pos_ref, out_ref, gbuf, sem, *,
                         scale, tb, seq_len, vocab, unroll):
    tok = _hbm_gather_tile(ids_ref, emb_hbm, gbuf, sem, tb=tb, seq_len=seq_len,
                           vocab=vocab, unroll=unroll)
    if scale != 1.0:
        tok = tok * scale
    out_ref[...] = (tok + pos_ref[...].astype(jnp.float32)).astype(out_ref.dtype)


def embed_hbm_kernel(ids_ref, emb_hbm, out_ref, gbuf, sem, *,
                     scale, tb, seq_len, vocab, unroll):
    tok = _hbm_gather_tile(ids_ref, emb_hbm, gbuf, sem, tb=tb, seq_len=seq_len,
                           vocab=vocab, unroll=unroll)
    if scale != 1.0:
        tok = tok * scale
    out_ref[...] = tok.astype(out_ref.dtype)


# ----------------------------------------------------------------------------
# pallas_call wrapper
# ----------------------------------------------------------------------------
def _pick_block_tokens(seq_len, d_model, itemsize, pack):
    """Largest token block that divides seq_len, is sublane-pack aligned and
    fits a ~12 MiB VMEM budget (2 gather slots + 2 out bufs + 2 pos bufs)."""
    budget = 12 << 20
    per_tok = d_model * (4 * itemsize + 2 * 4)
    cap = min(512, max(pack, budget // max(per_tok, 1)))
    cap = max(pack, (cap // pack) * pack)
    t = min(cap, (seq_len // pack) * pack)
    while t >= pack:
        if seq_len % t == 0:
            return t
        t -= pack
    return seq_len           # full sequence is always a legal block shape


def transformer_embedding(ids, table, pos=None, *, scale=1.0,
                          block_tokens=None, force_hbm_gather=False):
    """ids: (B, L) int; table: (V, D); pos: (L, D) or None.  Returns (B, L, D)."""
    B, L = ids.shape
    V, D = table.shape
    dtype = table.dtype
    itemsize = jnp.dtype(dtype).itemsize
    pack = max(8, 32 // itemsize)                  # 8 f32 / 16 bf16 / 32 int8 sublanes
    tb = int(block_tokens) if block_tokens else _pick_block_tokens(L, D, itemsize, pack)
    assert L % tb == 0, (L, tb)
    grid = (L // tb, B)                            # seq tiles outer, batch innermost
    ids = ids.astype(jnp.int32)
    scale = float(scale)
    has_pos = pos is not None
    if has_pos:
        pos = pos.astype(jnp.float32)

    table_bytes = V * D * itemsize
    # Fast path only when the table is small enough to sit in VMEM and the
    # one-hot MXU work stays negligible; otherwise per-row HBM DMA gather.
    use_vmem_table = (not force_hbm_gather) and table_bytes <= (2 << 20) and V <= 1024
    assert use_vmem_table or V >= tb, "HBM gather path needs vocab >= block_tokens"

    out_shape = jax.ShapeDtypeStruct((B, L, D), dtype)

    if use_vmem_table:
        split = itemsize >= 4                       # exact selection for f32 tables
        ids_in = ids.reshape(B, L, 1)               # free reshape; ids stay 2-D in-kernel
        ids_spec = pl.BlockSpec((None, tb, 1), lambda j, b: (b, j, 0))
        tab_spec = pl.BlockSpec((V, D), lambda j, b: (0, 0))   # resident, fetched once
        out_spec = pl.BlockSpec((None, tb, D), lambda j, b: (b, j, 0))
        dim_sem = ("parallel", "parallel")
        flops = (6 if split else 2) * B * L * V * D + 2 * B * L * D
        bytes_accessed = 4 * B * L + table_bytes + B * L * D * itemsize
        vmem_need = 2 * table_bytes + 4 * V * D * 4 + tb * V * 4 + 4 * tb * D * 4
        if has_pos:
            kern = functools.partial(embed_vmem_pos_kernel, vocab=V, scale=scale,
                                     split=split)
            in_specs = [ids_spec, tab_spec,
                        pl.BlockSpec((tb, D), lambda j, b: (j, 0))]
            args = (ids_in, table, pos)
            bytes_accessed += L * D * 4
            vmem_need += 2 * tb * D * 4
        else:
            kern = functools.partial(embed_vmem_kernel, vocab=V, scale=scale,
                                     split=split)
            in_specs = [ids_spec, tab_spec]
            args = (ids_in, table)
        grid_spec = pltpu.PrefetchScalarGridSpec(
            num_scalar_prefetch=0, grid=grid, in_specs=in_specs, out_specs=out_spec)
    else:
        ids_in = ids.reshape(-1)                    # 1-D SMEM prefetch (minimal padding)
        out_spec = pl.BlockSpec((None, tb, D), lambda j, b, ids_s: (b, j, 0))
        # Batch axis 'arbitrary': sequential per core, so the cross-step
        # gather prefetch targets the step that actually runs next.
        dim_sem = ("parallel", "arbitrary")
        unroll = tb <= 64
        flops = 2 * B * L * D
        bytes_accessed = 4 * B * L + 2 * B * L * D * itemsize
        vmem_need = 4 * tb * D * itemsize            # 2 gather slots + 2 out bufs
        scratch = [pltpu.VMEM((2, tb, D), dtype), pltpu.SemaphoreType.DMA((2,))]
        if has_pos:
            kern = functools.partial(embed_hbm_pos_kernel, scale=scale, tb=tb,
                                     seq_len=L, vocab=V, unroll=unroll)
            in_specs = [pl.BlockSpec(memory_space=pl.ANY),                 # table (HBM)
                        pl.BlockSpec((tb, D), lambda j, b, ids_s: (j, 0))]  # pos tile
            args = (ids_in, table, pos)
            bytes_accessed += L * D * 4
            vmem_need += 2 * tb * D * 4
        else:
            kern = functools.partial(embed_hbm_kernel, scale=scale, tb=tb,
                                     seq_len=L, vocab=V, unroll=unroll)
            in_specs = [pl.BlockSpec(memory_space=pl.ANY)]
            args = (ids_in, table)
        grid_spec = pltpu.PrefetchScalarGridSpec(
            num_scalar_prefetch=1, grid=grid, in_specs=in_specs,
            out_specs=out_spec, scratch_shapes=scratch)

    cparams = dict(dimension_semantics=dim_sem)
    if vmem_need > (12 << 20):                      # only raise the scoped limit if needed
        cparams["vmem_limit_bytes"] = int(min(vmem_need + (16 << 20), 64 << 20))

    return pl.pallas_call(
        kern,
        out_shape=out_shape,
        grid_spec=grid_spec,
        compiler_params=pltpu.CompilerParams(**cparams),
        cost_estimate=pl.CostEstimate(flops=int(flops), transcendentals=0,
                                      bytes_accessed=int(bytes_accessed)),
    )(*args)


# ----------------------------------------------------------------------------
# Module wrapper + pure-JAX reference
# ----------------------------------------------------------------------------
def sinusoidal_positional_encoding(max_len, d_model):
    pos = jnp.arange(max_len, dtype=jnp.float32)[:, None]
    idx = jnp.arange(0, d_model, 2, dtype=jnp.float32)
    inv_freq = jnp.exp(-(math.log(10000.0) / d_model) * idx)
    ang = pos * inv_freq[None, :]
    pe = jnp.zeros((max_len, d_model), jnp.float32)
    pe = pe.at[:, 0::2].set(jnp.sin(ang))
    pe = pe.at[:, 1::2].set(jnp.cos(ang))
    return pe


class TransformerEmbeddingPallas:
    """Pallas port of TransformerEmbedding(token_embed, pos_embed=None)."""

    def __init__(self, vocab_size, d_model, max_len, key,
                 use_pos_embed=True, scale_by_sqrt_dim=False):
        self.d_model = d_model
        self.table = jax.random.normal(key, (vocab_size, d_model), jnp.float32)
        self.pe = (sinusoidal_positional_encoding(max_len, d_model)
                   if use_pos_embed else None)
        self.scale = math.sqrt(d_model) if scale_by_sqrt_dim else 1.0
        # TODO(synk): dropout carried by some PositionalEncoding impls is not
        # applied (inference/identity semantics; the spec's forward adds none).

    def __call__(self, token_ids, *, force_hbm_gather=False):
        _, L = token_ids.shape
        pos = None if self.pe is None else self.pe[:L]
        return transformer_embedding(token_ids, self.table, pos, scale=self.scale,
                                     force_hbm_gather=force_hbm_gather)


def reference_transformer_embedding(ids, table, pos=None, scale=1.0):
    out = table[ids].astype(jnp.float32) * scale
    if pos is not None:
        out = out + pos[None, :, :]
    return out.astype(table.dtype)


# ----------------------------------------------------------------------------
# Self-test
# ----------------------------------------------------------------------------
if __name__ == "__main__":
    batch, seq, vocab, d_model, max_len = 2, 8, 64, 32, 32

    root = jax.random.PRNGKey(0)
    k_tab, k_ids = jax.random.split(root)

    module = TransformerEmbeddingPallas(vocab, d_model, max_len, k_tab,
                                        use_pos_embed=True)
    ids = jax.random.randint(k_ids, (batch, seq), 0, vocab, dtype=jnp.int32)
    ref = reference_transformer_embedding(ids, module.table, module.pe[:seq],
                                          module.scale)

    # 1) small-vocab fast path (VMEM-resident table, one-hot MXU gather)
    out = jax.block_until_ready(module(ids))
    assert out.shape == (batch, seq, d_model)
    assert jnp.allclose(out, ref, atol=1e-5, rtol=1e-5), "mismatch (fast path, pos)"

    # 2) HBM row-gather path (double-buffered per-row DMAs), forced
    out_hbm = jax.block_until_ready(module(ids, force_hbm_gather=True))
    assert jnp.allclose(out_hbm, ref, atol=1e-5, rtol=1e-5), "mismatch (HBM path, pos)"

    # 3) pos_embed=None variant of the PyTorch module (token embedding only)
    module_np = TransformerEmbeddingPallas(vocab, d_model, max_len, k_tab,
                                           use_pos_embed=False)
    ref_np = reference_transformer_embedding(ids, module_np.table, None,
                                             module_np.scale)
    out_np = jax.block_until_ready(module_np(ids))
    assert jnp.allclose(out_np, ref_np, atol=1e-5, rtol=1e-5), "mismatch (no pos)"
    out_np_hbm = jax.block_until_ready(module_np(ids, force_hbm_gather=True))
    assert jnp.allclose(out_np_hbm, ref_np, atol=1e-5, rtol=1e-5), "mismatch (no pos, HBM)"

    print("KERNEL_OK")
</pallas_src>

<mosaic_0001>
module attributes {stable_mosaic.version = 11 : i64} {
  func.func @embed_vmem_pos_kernel(%arg0: i32, %arg1: i32, %arg2: memref<1x8x1xi32, #tpu.memory_space<vmem>>, %arg3: memref<64x32xf32, #tpu.memory_space<vmem>>, %arg4: memref<8x32xf32, #tpu.memory_space<vmem>>, %arg5: memref<1x8x32xf32, #tpu.memory_space<vmem>>) attributes {dimension_semantics = [#tpu.dimension_semantics<parallel>, #tpu.dimension_semantics<parallel>], iteration_bounds = array<i64: 1, 2>, scalar_prefetch = 0 : i64, scratch_operands = 0 : i64, tpu.core_type = #tpu.core_type<tc>, window_params = [{transform_indices = @transform_0, window_bounds = array<i64: 1, 8, 1>}, {pipeline_mode = #tpu.pipeline_mode<synchronous>, transform_indices = @transform_1, window_bounds = array<i64: 64, 32>}, {transform_indices = @transform_2, window_bounds = array<i64: 8, 32>}, {transform_indices = @transform_3, window_bounds = array<i64: 1, 8, 32>}]} {
    %c0 = arith.constant 0 : index
    %c0_0 = arith.constant 0 : index
    %c0_1 = arith.constant 0 : index
    %0 = vector.load %arg2[%c0, %c0_0, %c0_1] : memref<1x8x1xi32, #tpu.memory_space<vmem>>, vector<1x8x1xi32>
    %1 = vector.shape_cast %0 : vector<1x8x1xi32> to vector<8x1xi32>
    %c0_i32 = arith.constant 0 : i32
    %c63_i32 = arith.constant 63 : i32
    %2 = vector.broadcast %c0_i32 : i32 to vector<8x1xi32>
    %3 = arith.maxsi %2, %1 : vector<8x1xi32>
    %4 = vector.broadcast %c63_i32 : i32 to vector<8x1xi32>
    %5 = arith.minsi %4, %3 : vector<8x1xi32>
    %6 = tpu.iota {dimensions = array<i32: 1>} : vector<8x64xi32>
    %7 = vector.broadcast %5 : vector<8x1xi32> to vector<8x64xi32>
    %8 = arith.cmpi eq, %7, %6 : vector<8x64xi32>
    %9 = arith.extui %8 : vector<8x64xi1> to vector<8x64xi32>
    %10 = arith.sitofp %9 : vector<8x64xi32> to vector<8x64xf32>
    %c0_2 = arith.constant 0 : index
    %c0_3 = arith.constant 0 : index
    %11 = vector.load %arg3[%c0_2, %c0_3] : memref<64x32xf32, #tpu.memory_space<vmem>>, vector<64x32xf32>
    %12 = arith.truncf %11 : vector<64x32xf32> to vector<64x32xbf16>
    %13 = arith.extf %12 : vector<64x32xbf16> to vector<64x32xf32>
    %14 = arith.subf %11, %13 : vector<64x32xf32>
    %15 = arith.truncf %14 : vector<64x32xf32> to vector<64x32xbf16>
    %16 = arith.extf %15 : vector<64x32xbf16> to vector<64x32xf32>
    %17 = arith.subf %14, %16 : vector<64x32xf32>
    %cst = arith.constant dense<0.000000e+00> : vector<8x32xf32>
    %18 = tpu.matmul %10, %13, %cst {dimension_numbers = #tpu.dot_dimension_numbers<[1], [0], [0], [1], [0, 0, 1, 1], [], []>} : vector<8x64xf32>, vector<64x32xf32>, vector<8x32xf32> -> vector<8x32xf32>
    %cst_4 = arith.constant dense<0.000000e+00> : vector<8x32xf32>
    %19 = tpu.matmul %10, %16, %cst_4 {dimension_numbers = #tpu.dot_dimension_numbers<[1], [0], [0], [1], [0, 0, 1, 1], [], []>} : vector<8x64xf32>, vector<64x32xf32>, vector<8x32xf32> -> vector<8x32xf32>
    %20 = arith.addf %18, %19 : vector<8x32xf32>
    %cst_5 = arith.constant dense<0.000000e+00> : vector<8x32xf32>
    %21 = tpu.matmul %10, %17, %cst_5 {dimension_numbers = #tpu.dot_dimension_numbers<[1], [0], [0], [1], [0, 0, 1, 1], [], []>} : vector<8x64xf32>, vector<64x32xf32>, vector<8x32xf32> -> vector<8x32xf32>
    %22 = arith.addf %20, %21 : vector<8x32xf32>
    %c0_6 = arith.constant 0 : index
    %c0_7 = arith.constant 0 : index
    %23 = vector.load %arg4[%c0_6, %c0_7] : memref<8x32xf32, #tpu.memory_space<vmem>>, vector<8x32xf32>
    %24 = arith.addf %22, %23 : vector<8x32xf32>
    %c0_8 = arith.constant 0 : index
    %c0_9 = arith.constant 0 : index
    %c0_10 = arith.constant 0 : index
    %25 = vector.load %arg5[%c0_8, %c0_9, %c0_10] : memref<1x8x32xf32, #tpu.memory_space<vmem>>, vector<1x8x32xf32>
    %26 = vector.shape_cast %25 : vector<1x8x32xf32> to vector<8x32xf32>
    %27 = vector.shape_cast %24 : vector<8x32xf32> to vector<1x8x32xf32>
    tpu.vector_store %arg5[%c0_8, %c0_9, %c0_10], %27 {strides = array<i32>} : memref<1x8x32xf32, #tpu.memory_space<vmem>>, vector<1x8x32xf32>,
    return
  }
  func.func @transform_0(%arg0: i32, %arg1: i32) -> (i32, i32, i32) {
    %c0_i32 = arith.constant 0 : i32
    %c0_i32_0 = arith.constant 0 : i32
    return %arg1, %arg0, %c0_i32 : i32, i32, i32
  }
  func.func @transform_1(%arg0: i32, %arg1: i32) -> (i32, i32) {
    %c0_i32 = arith.constant 0 : i32
    %c0_i32_0 = arith.constant 0 : i32
    %c0_i32_1 = arith.constant 0 : i32
    return %c0_i32, %c0_i32_0 : i32, i32
  }
  func.func @transform_2(%arg0: i32, %arg1: i32) -> (i32, i32) {
    %c0_i32 = arith.constant 0 : i32
    %c0_i32_0 = arith.constant 0 : i32
    return %arg0, %c0_i32 : i32, i32
  }
  func.func @transform_3(%arg0: i32, %arg1: i32) -> (i32, i32, i32) {
    %c0_i32 = arith.constant 0 : i32
    %c0_i32_0 = arith.constant 0 : i32
    return %arg1, %arg0, %c0_i32 : i32, i32, i32
  }
}

</mosaic_0001>

<bundles_post_ra>
// kernel: tpu_custom_call.1
= control target key start
LH: loop header
LB: loop body
LE: loop exit
PB: predicated region body
PF: predicated region fallthrough
CT: control target
= control target key end

     0   :  { %8 = vsyncpa [#allocation3], 0  ;;  %s1044_s0 = inlined_call_operand.vmem [shape: s32[2,8,1], index: 0, kind: input, shape index: {}]   ;;  %s1045_s1 = inlined_call_operand.vmem [shape: f32[64,32], index: 1, kind: input, shape index: {}]   ;;  %s1046_s2 = inlined_call_operand.vmem [shape: f32[8,32], index: 2, kind: input, shape index: {}]   ;;  %s1047_s3 = inlined_call_operand.hbm [shape: f32[2,8,32], index: 3, kind: output, shape index: {}]  }
   0x1   :  { %10 = vsyncpa [#allocation3 + $0x1], 0  ;;  %s890_s12 = smov 0   ;;  %s892_s13 = smov 0  }
   0x2   :  { %s894_s14 = smov 0   ;;  %s896_s15 = smov 0  }
   0x3   :  { %s898_s16 = smov 0   ;;  %s900_s17 = smov 0  }
   0x4 LB: > { %s589_s18 = sadd.s32 4294967295, %s863_s17   ;;  %s590_s19 = sadd.s32 4294967294, %s863_s17   ;;  %s863_s17 = sphi %s900_s17, %s16_s17   ;;  %s859_s16 = sphi %s898_s16, %s1054_s16   ;;  %s855_s15 = sphi %s896_s15, %s1053_s15   ;;  %s851_s14 = sphi %s894_s14, %s1052_s14   ;;  %s847_s13 = sphi %s892_s13, %s1051_s13   ;;  %s843_s12 = sphi %s890_s12, %s1050_s12  }
   0x5   : > { %s25_s20 = sadd.s32 1, %s859_s16  ;;  %s112_s21 = sadd.s32 1, %s851_s14 }
   0x6   : > { %p26_p0 = scmp.ge.s32.totalorder %s25_s20, 2  ;;  %p122_p1 = scmp.ne.s32.totalorder %s851_s14, %s847_s13 }
   0x7   : > { %p123_p2 = scmp.eq.s32.totalorder %s589_s18, 1  ;;  %p128_p3 = scmp.ne.s32.totalorder %s847_s13, %s843_s12 }
   0x8   : > { %s1056_s20 = smov (%p26_p0, %s25_s20), 0  ;;  %p129_p5 = scmp.eq.s32.totalorder %s590_s19, 1 }
   0x9   : > { %p930_p4 = por %p123_p2, %p122_p1  ;;  %s107_s23 = ssub.s32 %s859_s16, %s1056_s20 }
   0xa   : > { %p594_p6 = scmp.ge.s32.totalorder %s863_s17, 1  ;;  %p110_p7 = scmp.eq.s32.totalorder %s107_s23, 0 }
   0xb   : > { %p937_p8 = por %p129_p5, %p128_p3  ;;  %p167_p9 = scmp.lt.s32.totalorder %s863_s17, 3 }
   0xc   : > { %s943_s25 = scalar_select %p110_p7, %s851_s14, %s112_s21  }
   0xd   : > { %p168_p10 = pnand %p594_p6, %p167_p9 }
   0xe   : > { %p197_p11 = scmp.lt.s32.totalorder (!%p168_p10), %s855_s15, 1  ;;  %v221_v0 = vld [vmem:[%s1045_s1] sm:$0xff] (!%p168_p10)  ;;  %v222_v1 = vld [vmem:[%s1045_s1 + $0x8] sm:$0xff] (!%p168_p10)  ;;  %v223_v2 = vld [vmem:[%s1045_s1 + $0x10] sm:$0xff] (!%p168_p10)  ;;  %v865_v3 = vmov (!%p168_p10), 0   ;;  %v866_v4 = vmov (!%p168_p10), 0.0|0.0   ;;  %v213_v58 = vlaneseq (!%p168_p10) }
   0xf   : > { %171 = sbr.rel (%p168_p10) target bundleno = 407 (0x197), region = 32  ;;  %784 = vset.pattern.permute.xlu0 (!%p168_p10), %v865_v3  ;;  %689 = vmatprep.subr.bf16.mxu0 (!%p168_p10), %v866_v4  ;;  %v229_v5 = vpack.c.bf16 (!%p168_p10), %v222_v1, %v221_v0  ;;  %v224_v6 = vld [vmem:[%s1045_s1 + $0x18] sm:$0xff] (!%p168_p10)  ;;  %v225_v7 = vld [vmem:[%s1045_s1 + $0x20] sm:$0xff] (!%p168_p10)  ;;  %v226_v8 = vld [vmem:[%s1045_s1 + $0x28] sm:$0xff] (!%p168_p10)  ;;  %vm867_vm2 = vmmov (!%p168_p10), 0   ;;  %v868_v53 = vmov (!%p168_p10), 0.0  }
  0x10   : > { %701 = vmatprep.subr.bf16.mxu1 (!%p168_p10), %v866_v4  ;;  %v230_v9 = vpack.c.bf16 (!%p168_p10), %v224_v6, %v223_v2  ;;  %v231_v10 = vpack.c.bf16 (!%p168_p10), %v226_v8, %v225_v7  ;;  %v227_v11 = vld [vmem:[%s1045_s1 + $0x30] sm:$0xff] (!%p168_p10)  ;;  %v228_v12 = vld [vmem:[%s1045_s1 + $0x38] sm:$0xff] (!%p168_p10)  ;;  %648 = vmatprep.mubr.msk.f32.mxu0 (!%p168_p10), %vm867_vm2, %v868_v53  ;;  %v214_v59 = vand.u32 (!%p168_p10), 127, %v213_v58  ;;  %vm269_vm3 = vcmask (!%p168_p10), 523264   ;;  %s194_s30 = sand.u32 (!%p168_p10), 1, %s847_s13   ;;  %s602_s7 = sshll.u32 (!%p168_p10), %s855_s15, 7 }
  0x11   : > { %v233_v13 = vunpack.c.l.bf16 (!%p168_p10), %v229_v5  ;;  %v234_v14 = vunpack.c.h.bf16 (!%p168_p10), %v229_v5  ;;  %703 = vmatpush3.bf16.msra.mxu1 (!%p168_p10), %v229_v5  ;;  %v232_v15 = vpack.c.bf16 (!%p168_p10), %v228_v12, %v227_v11  ;;  %667 = vmatprep.mubr.msk.f32.mxu1 (!%p168_p10), %vm867_vm2, %v868_v53  ;;  %s595_s4 = sshll.u32 (!%p168_p10), %s194_s30, 3  ;;  %v484_v5 = vld [vmem:[%s1046_s2] sm:$0xff] (!%p168_p10)  ;;  %vm486_vm5 = vcmask (!%p168_p10), 261120   ;;  %s997_s18 = scalar_lea.hbm (!%p168_p10), %s1047_s3, %s602_s7 }
  0x12   : > { %v235_v16 = vunpack.c.l.bf16 (!%p168_p10), %v230_v9  ;;  %v236_v17 = vunpack.c.h.bf16 (!%p168_p10), %v230_v9  ;;  %704 = vmatprep.subr.bf16.mxu1 (!%p168_p10), %v866_v4  ;;  %v237_v18 = vunpack.c.l.bf16 (!%p168_p10), %v231_v10  ;;  %v238_v19 = vunpack.c.h.bf16 (!%p168_p10), %v231_v10  ;;  %s196_s8 = scalar_lea.vmem (!%p168_p10), [#allocation2], %s595_s4  ;;  %s489_s19 = scalar_lea.sflag (!%p168_p10), [#allocation3], %s194_s30 }
  0x13   : > { %v241_v20 = vsub.f32 (!%p168_p10), %v221_v0, %v233_v13  ;;  %v242_v21 = vsub.f32 (!%p168_p10), %v222_v1, %v234_v14  ;;  %v239_v22 = vunpack.c.l.bf16 (!%p168_p10), %v232_v15  ;;  %v240_v23 = vunpack.c.h.bf16 (!%p168_p10), %v232_v15  ;;  %s503_s9 = sshll.u32 (!%p168_p10), %s196_s8, 4  ;;  %s999_s9 = int_to_ptr.vmem [resolvable:$true] %s503_s9 }
  0x14   : > { %v243_v25 = vsub.f32 (!%p168_p10), %v223_v2, %v235_v16  ;;  %v244_v26 = vsub.f32 (!%p168_p10), %v224_v6, %v236_v17  ;;  %v245_v27 = vsub.f32 (!%p168_p10), %v225_v7, %v237_v18  ;;  %v246_v28 = vsub.f32 (!%p168_p10), %v226_v8, %v238_v19  ;;  %s785_s21 = scalar_lea.vmem (!%p168_p10), %s999_s9, 128 }
  0x15   : > { %v249_v29 = vpack.c.bf16 (!%p168_p10), %v242_v21, %v241_v20  ;;  %706 = vmatpush3.bf16.msra.mxu1 (!%p168_p10), %v230_v9  ;;  %v247_v30 = vsub.f32 (!%p168_p10), %v227_v11, %v239_v22  ;;  %v248_v31 = vsub.f32 (!%p168_p10), %v228_v12, %v240_v23  ;;  %p786_p12 = scmp.ne.s32.totalorder (!%p168_p10), %s999_s9, %s785_s21 }
  0x16   : > { %s198_s11 = scalar_select %p197_p11, %s855_s15, 1  ;;  %v250_v33 = vpack.c.bf16 %v244_v26, %v243_v25  ;;  %v251_v34 = vpack.c.bf16 %v246_v28, %v245_v27  ;;  %707 = vmatprep.subr.bf16.mxu1 %v866_v4 }
  0x17   : > { %v253_v35 = vunpack.c.l.bf16 %v249_v29  ;;  %v254_v36 = vunpack.c.h.bf16 %v249_v29  ;;  %691 = vmatpush3.bf16.msra.mxu0 %v249_v29  ;;  %v252_v37 = vpack.c.bf16 %v248_v31, %v247_v30  ;;  %p787_p13 = pnand %p786_p12, %p930_p4  ;;  %s869_s15 = smov [#allocation2]  }
  0x18   : > { %s596_s26 = sshll.u32 %s198_s11, 3  ;;  %692 = vmatprep.subr.bf16.mxu0 %v866_v4  ;;  %v255_v39 = vunpack.c.l.bf16 %v250_v33  ;;  %v256_v40 = vunpack.c.h.bf16 %v250_v33  ;;  %v257_v41 = vunpack.c.l.bf16 %v251_v34  ;;  %v258_v44 = vunpack.c.h.bf16 %v251_v34  ;;  %s789_s23 = sshll.u32 %s869_s15, 4  ;;  %s790_s23 = int_to_ptr.vmem [resolvable:$false] %s789_s23 }
  0x19   : > { %s203_s29 = scalar_lea.vmem %s1044_s0, %s596_s26  ;;  %v261_v42 = vsub.f32 %v241_v20, %v253_v35  ;;  %v262_v43 = vsub.f32 %v242_v21, %v254_v36  ;;  %709 = vmatpush3.bf16.msra.mxu1 %v231_v10  ;;  %v259_v45 = vunpack.c.l.bf16 %v252_v37  ;;  %v260_v49 = vunpack.c.h.bf16 %v252_v37  ;;  %p788_p0 = pneg %p787_p13 }
  0x1a   : > { %v208_v24 = vld [vmem:[%s203_s29] sm:$0xff]  ;;  %v263_v46 = vsub.f32 %v243_v25, %v255_v39  ;;  %v264_v47 = vsub.f32 %v244_v26, %v256_v40  ;;  %v265_v48 = vsub.f32 %v245_v27, %v257_v41  ;;  %710 = vmatprep.subr.bf16.mxu1 %v866_v4  ;;  %v266_v50 = vsub.f32 %v246_v28, %v258_v44  ;;  %s791_s26 = scalar_lea.vmem %s790_s23, 256  ;;  %p792_p1 = scmp.lt.s32.totalorder %s999_s9, %s790_s23 }
  0x1b   : > { %vm209_vm0 = vcmp.gt.s32.totalorder %v208_v24, 0  ;;  %694 = vmatpush3.bf16.msra.mxu0 %v250_v33  ;;  %v267_v51 = vsub.f32 %v247_v30, %v259_v45  ;;  %v268_v52 = vsub.f32 %v248_v31, %v260_v49  ;;  %v714_v54 = vpack.c.bf16 %v262_v43, %v261_v42  ;;  %p793_p2 = scmp.lt.s32.totalorder %s791_s26, %s785_s21 }
  0x1c   : > { %v210_v32 = vsel %vm209_vm0, %v208_v24, 0  ;;  %695 = vmatprep.subr.bf16.mxu0 %v866_v4  ;;  %v717_v55 = vpack.c.bf16 %v264_v47, %v263_v46  ;;  %v720_v56 = vpack.c.bf16 %v266_v50, %v265_v48 }
  0x1d   : > { %vm211_vm1 = vcmp.lt.s32.totalorder %v210_v32, 63  ;;  %712 = vmatpush3.bf16.msra.mxu1 %v232_v15  ;;  %v723_v57 = vpack.c.bf16 %v268_v52, %v267_v51  ;;  %p794_p3 = por %p793_p2, %p792_p1 }
  0x1e   : > { %v212_v38 = vsel %vm211_vm1, %v210_v32, 63 }
  0x1f   : > { %216 = vperm.xlu0 %784, %v212_v38   ;;  %697 = vmatpush3.bf16.msra.mxu0 %v251_v34  ;;  %p795_p5 = pnand %p794_p3, %p788_p0 }
  0x20   : > { %698 = vmatprep.subr.bf16.mxu0 %v866_v4 }
  0x23   : > { %700 = vmatpush3.bf16.msra.mxu0 %v252_v37 }
  0x24   : > { %713 = vmatprep.subr.bf16.mxu0 %v866_v4 }
  0x9e   : > { %v217_v60 = vpop.permute.xlu0 %216 }
  0x9f   : > { %vm218_vm4 = vcmp.eq.s32.totalorder %v217_v60, %v214_v59 }
  0xa0   : > { %v597_v61 = vsel %vm218_vm4, 1.0, %v868_v53 }
  0xa1   : > { %649 = vmatmul.mubr.msk.f32.vlgmr.msra.gmra.mrb[0].mxu0 %vm269_vm3, %v597_v61  ;;  %668 = vmatmul.mubr.msk.f32.vlgmr.msra.gmra.mrb[0].mxu1 %vm269_vm3, %v597_v61 }
  0xa2   : > { %715 = vmatpush3.bf16.msra.mxu0 %v714_v54  ;;  %686 = vmatprep.mubr.msk.f32.mxu0 %vm867_vm2, %v868_v53 }
  0xa3   : > { %716 = vmatprep.subr.bf16.mxu0 %v866_v4 }
  0xa6   : > { %718 = vmatpush3.bf16.msra.mxu0 %v717_v55 }
  0xa7   : > { %719 = vmatprep.subr.bf16.mxu0 %v866_v4 }
  0xaa   : > { %721 = vmatpush3.bf16.msra.mxu0 %v720_v56 }
  0xab   : > { %722 = vmatprep.subr.bf16.mxu0 %v866_v4 }
  0xae   : > { %724 = vmatpush3.bf16.msra.mxu0 %v723_v57 }
  0xb1   : > { %687 = vmatmul.mubr.msk.f32.vlgmr.msra.gmra.mrb[2].mxu0 %vm269_vm3, %v597_v61 }
 0x174   : > { %v339_v62 = vpop.f32.mrb[0].mxu0  ;;  %v409_v63 = vpop.f32.mrb[0].mxu1 }
 0x175   : > { %v410_v0 = vadd.f32 %v409_v63, %v339_v62  ;;  %v650_v1 = vpop.f32.mrb[1].mxu0  ;;  %v669_v2 = vpop.f32.mrb[1].mxu1 }
 0x184   : > { %v479_v3 = vpop.f32.mrb[2].mxu0 }
 0x185   : > { %v483_v6 = vadd.f32 %v479_v3, %v410_v0  ;;  %v688_v4 = vpop.f32.mrb[3].mxu0 }
 0x187   : > { %v485_v7 = vadd.f32 %v484_v5, %v483_v6 }
 0x189   : > { %487 = vst.msk [vmem:[%s196_s8] sm:$0xff] %vm486_vm5, %v485_v7 }
 0x18a   : > { %798 = shalt.err (!%p795_p5)
}
 0x18b   : > { %s799_s27 = scalar_lea.hbm %s997_s18, 128  ;;  %s803_s30 = scalar_lea.hbm %s1047_s3, 256 }
 0x18c   : > { %p800_p6 = scmp.ne.s32.totalorder %s997_s18, %s799_s27  ;;  %p804_p10 = scmp.lt.u32.totalorder %s997_s18, %s1047_s3 }
 0x18d   : > { %p805_p11 = scmp.lt.u32.totalorder %s803_s30, %s799_s27  ;;  %p807_p13 = scmp.lt.u32.totalorder %s799_s27, %s997_s18 }
 0x18e   : > { %p801_p7 = pnand %p800_p6, %p930_p4 }
 0x18f   : > { %p806_p12 = por %p805_p11, %p804_p10 }
 0x190   : > { %p802_p9 = pneg %p801_p7 }
 0x191   : > { %p808_p0 = por %p807_p13, %p806_p12 }
 0x193   : > { %p809_p1 = pnand %p808_p0, %p802_p9 }
 0x195   : > { %812 = shalt.err (!%p809_p1)
}
 0x196   : > { %725 = dma.vmem_to_hbm [thread:$0]  (%p930_p4), %s999_s9, 128, %s997_s18, %s489_s19  }
 0x197 PF: > { %p731_p2 = scmp.ge.s32.totalorder %s863_s17, 2  ;;  %s515_s6 = sand.u32 1, %s843_s12  }
 0x198   : > { %s516_s7 = scalar_lea.sflag [#allocation3], %s515_s6 }
 0x199   : > { %p728_p3 = pnand %p731_p2, %p937_p8 }
 0x19b   : > { %838 = dma.done.wait (!%p728_p3), %s516_s7, 128  }
 0x19c   : > { %840 = vsyncadd (!%p728_p3), %s516_s7, 4294967168  ;;  %s16_s17 = sadd.s32 1, %s863_s17   ;;  %s1050_s12 = smov %s847_s13 }
 0x19d   : > { %p13_p5 = scmp.ge.s32.totalorder %s16_s17, 4   ;;  %s1051_s13 = smov %s851_s14 }
 0x19e   : > { %s1052_s14 = smov %s943_s25  ;;  %s1053_s15 = smov %s859_s16 }
 0x19f   : > { %s1054_s16 = smov %s1056_s20  ;;  %15 = sbr.rel (!%p13_p5) target bundleno = 4 (0x4), region = 70 }
 0x1a6   :  { %521 = vsyncpa [#allocation3], 1 }
 0x1a7   :  { %523 = vsyncpa [#allocation3 + $0x1], 1 }

</bundles_post_ra>
